<compile_context>
chip_gen: v7x
topology: tpu7x:2x2x1
jax: 0.10.0
libtpu: 0.0.40
codegen_flags: <defaults>
</compile_context>

<pallas_src>
import jax
import jax.numpy as jnp
import numpy as np
from jax import lax
from jax.experimental import pallas as pl
from jax.experimental.pallas import tpu as pltpu


def summary_kernel(ent_ref, nbr_ref, start_ref, end_ref, invc_ref,
                   wt_ref, wn_ref, bnode_ref, wrh_ref, wrt_ref, br_ref,
                   wp_ref, bp_ref, out_ref):
    f32 = jnp.float32
    bf16 = jnp.bfloat16

    two_tb = ent_ref.shape[0]        # node rows in this tile: [heads ; tails]
    tb = two_tb // 2                 # support pairs in this tile
    maxn = nbr_ref.shape[0]          # neighbor slab rows for this tile
    hid = br_ref.shape[1]            # hidden_size
    r_out = bp_ref.shape[1]          # num_relations - 1

    # --- EmbeddingBag(mode='mean') as an in-kernel segmented mean over this
    #     tile's neighbor slab only (bounded by MAXN, not the full table) ----
    idx = lax.broadcasted_iota(jnp.int32, (two_tb, maxn), 1)
    member = (idx >= start_ref[...]) & (idx < end_ref[...])
    mem_bf = jnp.where(member, 1.0, 0.0).astype(bf16)            # exact 0/1
    # segmented sum on the MXU, mean scaling (precomputed 1/count) on the VPU
    agg = jnp.dot(mem_bf, nbr_ref[...],
                  preferred_element_type=f32) * invc_ref[...]     # [2tb, 2E]

    # --- transform_layer + neighbor_layer (fused bias bt+bn), ReLU ----------
    node = jnp.maximum(
        jnp.dot(ent_ref[...], wt_ref[...], preferred_element_type=f32)
        + jnp.dot(agg.astype(bf16), wn_ref[...], preferred_element_type=f32)
        + bnode_ref[...],
        0.0)                                                      # [2tb, H]

    # --- relation_layer: heads are rows [:tb], tails rows [tb:] -------------
    node_h = node[:tb].astype(bf16)
    node_t = node[tb:].astype(bf16)
    pair = jnp.maximum(
        jnp.dot(node_h, wrh_ref[...], preferred_element_type=f32)
        + jnp.dot(node_t, wrt_ref[...], preferred_element_type=f32)
        + br_ref[...],
        0.0)                                                      # [tb, H]

    # --- predict_layer (the predict=True branch) ----------------------------
    scores = (jnp.dot(pair.astype(bf16), wp_ref[...],
                      preferred_element_type=f32)
              + bp_ref[...])                                      # [tb, R-1]

    # --- single lane-dense store: [pair | scores | zero pad] ----------------
    pad = out_ref.shape[1] - hid - r_out
    pieces = [pair, scores]
    if pad > 0:
        pieces.append(jnp.zeros((tb, pad), f32))
    out_ref[...] = jnp.concatenate(pieces, axis=-1)


def summary_forward(entities, neighbor_entities, neighbor_relations, offsets,
                    entity_weight, relation_weight, params):
    """Returns (pair_embeddings [B, H], scores [B, num_relations-1])."""
    wt, bt, wn, bn, wr, br, wp, bp = params
    E = entity_weight.shape[1]
    H = wt.shape[1]
    R_out = wp.shape[1]
    n_nodes = int(entities.shape[0])            # 2 * batch_size
    B = n_nodes // 2
    N = int(neighbor_entities.shape[0])

    # ---- batch tiling: big tiles amortize the ~0.35us/step overhead and fill
    #      the MXU M dim; pad B so any batch size works. (On v5e, tb >= 64
    #      already saturates the 128-wide MXU; on v7x pick tb so that at
    #      production B there are >= 2 tiles to use both TensorCores.) --------
    TB_MAX = 256
    tb = B if B <= TB_MAX else TB_MAX
    ntiles = -(-B // tb)
    B_pad = ntiles * tb
    grid = (ntiles,)

    # ---- host-side segment bookkeeping (offsets/edges are host-side Python
    #      lists in the original module's forward as well) --------------------
    offsets_np = np.asarray(offsets, dtype=np.int64)              # [2B]
    starts_np = np.concatenate(
        [offsets_np, np.full(2 * (B_pad - B), N, dtype=np.int64)])  # [2B_pad]
    ends_np = np.concatenate([starts_np[1:], np.array([N], np.int64)])

    # reorder nodes so each tile's rows are [heads_tile ; tails_tile]
    pair_ids = np.arange(B_pad).reshape(ntiles, tb)
    node_order = np.concatenate([2 * pair_ids, 2 * pair_ids + 1],
                                axis=1).reshape(-1)               # [2B_pad]

    # per-tile contiguous neighbor row range of the flat neighbor table
    slab_start = starts_np[np.arange(ntiles) * 2 * tb]            # [ntiles]
    slab_end = ends_np[np.arange(ntiles) * 2 * tb + 2 * tb - 1]   # [ntiles]
    max_cnt = int(np.max(slab_end - slab_start)) if ntiles > 0 else 0
    MAXN = max(16, -(-max_cnt // 16) * 16)                        # mult. of 16

    # per-node relative bag [start, end) within its tile's slab + 1/count
    starts_re = starts_np[node_order]
    ends_re = ends_np[node_order]
    slab_per_node = np.repeat(slab_start, 2 * tb)
    starts_rel = (starts_re - slab_per_node).astype(np.int32).reshape(-1, 1)
    ends_rel = (ends_re - slab_per_node).astype(np.int32).reshape(-1, 1)
    inv_cnt = (1.0 / np.maximum(ends_re - starts_re, 1)
               ).astype(np.float32).reshape(-1, 1)                # empty bag->0

    # ---- plain-JAX glue: embedding row gathers ------------------------------
    # TODO(synk): graph.my_edges traversal stays host-side; at production
    # sizes these gathers should move in-kernel (pl.ANY-resident embedding
    # tables + per-tile row DMA) to avoid the HBM round trip.
    entities_np = np.asarray(entities, dtype=np.int64)
    ent_ids = np.concatenate(
        [entities_np, np.zeros(2 * (B_pad - B), np.int64)])[node_order]
    ent = entity_weight[jnp.asarray(ent_ids)].astype(jnp.bfloat16)   # [2B_pad,E]

    nbr = jnp.concatenate([entity_weight[neighbor_entities],
                           relation_weight[neighbor_relations]],
                          axis=-1).astype(jnp.bfloat16)              # [N, 2E]
    row_ids = slab_start[:, None] + np.arange(MAXN)[None, :]
    row_ids = np.clip(row_ids, 0, max(N - 1, 0))
    nbr_slabs = nbr[jnp.asarray(row_ids.reshape(-1))]        # [ntiles*MAXN, 2E]

    # weights: bf16 MXU inputs, f32 biases; bt+bn fused into one node bias
    wt_b = wt.astype(jnp.bfloat16)                                   # [E, H]
    wn_b = wn.astype(jnp.bfloat16)                                   # [2E, H]
    b_node = (bt + bn).reshape(1, H).astype(jnp.float32)
    wrh_b = wr[:H].astype(jnp.bfloat16)                              # [H, H]
    wrt_b = wr[H:].astype(jnp.bfloat16)                              # [H, H]
    br_b = br.reshape(1, H).astype(jnp.float32)
    wp_b = wp.astype(jnp.bfloat16)                                   # [H, R-1]
    bp_b = bp.reshape(1, R_out).astype(jnp.float32)

    OUT_LANES = ((H + R_out + 127) // 128) * 128   # lane-dense packed output

    def build_in_specs(single_buffer_resident):
        # grid-invariant (resident) operands: optionally single-buffered to
        # halve their VMEM footprint (v7x has only 64 MiB VMEM per core).
        def res(shape):
            if single_buffer_resident:
                return pl.BlockSpec(shape, lambda i: (0, 0),
                                    pipeline_mode=pl.Buffered(1))
            return pl.BlockSpec(shape, lambda i: (0, 0))
        return [
            pl.BlockSpec((2 * tb, E), lambda i: (i, 0)),        # ent
            pl.BlockSpec((MAXN, 2 * E), lambda i: (i, 0)),      # nbr slab
            pl.BlockSpec((2 * tb, 1), lambda i: (i, 0)),        # starts_rel
            pl.BlockSpec((2 * tb, 1), lambda i: (i, 0)),        # ends_rel
            pl.BlockSpec((2 * tb, 1), lambda i: (i, 0)),        # inv_cnt
            res((E, H)),                                        # wt
            res((2 * E, H)),                                    # wn
            res((1, H)),                                        # b_node
            res((H, H)),                                        # wr (head)
            res((H, H)),                                        # wr (tail)
            res((1, H)),                                        # br
            res((H, R_out)),                                    # wp
            res((1, R_out)),                                    # bp
        ]

    def call_kernel(single_buffer_resident):
        return pl.pallas_call(
            summary_kernel,
            grid=grid,
            in_specs=build_in_specs(single_buffer_resident),
            out_specs=pl.BlockSpec((tb, OUT_LANES), lambda i: (i, 0)),
            out_shape=jax.ShapeDtypeStruct((B_pad, OUT_LANES), jnp.float32),
            compiler_params=pltpu.CompilerParams(
                dimension_semantics=("parallel",),
                vmem_limit_bytes=48 * 1024 * 1024),
        )(ent, nbr_slabs,
          jnp.asarray(starts_rel), jnp.asarray(ends_rel), jnp.asarray(inv_cnt),
          wt_b, wn_b, b_node, wrh_b, wrt_b, br_b, wp_b, bp_b)

    try:
        packed = call_kernel(True)
    except Exception:
        # pipeline_mode / pl.Buffered not supported on this JAX build:
        # fall back to default double buffering for the resident operands.
        packed = call_kernel(False)

    pair = packed[:B, :H]
    scores = packed[:B, H:H + R_out]
    return pair, scores


if __name__ == "__main__":
    # ---- synthetic, deterministic setup ----
    B = 2              # batch of support pairs -> 2B = 4 entity nodes
    E = 32             # embedding_dim
    H = 32             # hidden_size
    NUM_ENT = 20
    NUM_REL = 9        # predict output dim = 8

    key = jax.random.PRNGKey(0)
    ks = jax.random.split(key, 10)
    entity_weight = jax.random.normal(ks[0], (NUM_ENT, E), jnp.float32) * 0.1
    relation_weight = jax.random.normal(ks[1], (NUM_REL, E), jnp.float32) * 0.1

    # Linear params stored as [in, out] (transposed vs. torch's [out, in]).
    wt = jax.random.normal(ks[2], (E, H), jnp.float32) * 0.1
    bt = jax.random.normal(ks[3], (H,), jnp.float32) * 0.1
    wn = jax.random.normal(ks[4], (2 * E, H), jnp.float32) * 0.1
    bn = jax.random.normal(ks[5], (H,), jnp.float32) * 0.1
    wr = jax.random.normal(ks[6], (2 * H, H), jnp.float32) * 0.1
    br = jax.random.normal(ks[7], (H,), jnp.float32) * 0.1
    wp = jax.random.normal(ks[8], (H, NUM_REL - 1), jnp.float32) * 0.1
    bp = jax.random.normal(ks[9], (NUM_REL - 1,), jnp.float32) * 0.1
    params = (wt, bt, wn, bn, wr, br, wp, bp)

    # TODO(synk): the graph edge traversal (self.graph.my_edges) is host-side
    # Python in the original module; here we use fixed synthetic neighbor lists.
    entities = jnp.array([3, 7, 11, 2], dtype=jnp.int32)                  # 2B nodes
    neighbor_entities = jnp.array([1, 4, 9, 5, 6, 0, 2, 8, 12, 13, 15, 7],
                                  dtype=jnp.int32)                        # N = 12
    neighbor_relations = jnp.array([0, 2, 1, 3, 4, 5, 6, 7, 0, 2, 3, 1],
                                   dtype=jnp.int32)
    offsets = jnp.array([0, 3, 5, 9], dtype=jnp.int32)                    # bag starts

    pair, scores = summary_forward(entities, neighbor_entities,
                                   neighbor_relations, offsets,
                                   entity_weight, relation_weight, params)
    jax.block_until_ready((pair, scores))

    # ---- pure-f32 JAX reference (torch-equivalent math, interleaved order) ----
    ent_emb = entity_weight[entities]
    nbr_ent = entity_weight[neighbor_entities]
    nbr_rel = relation_weight[neighbor_relations]
    N = neighbor_entities.shape[0]
    starts = offsets
    ends = jnp.concatenate([offsets[1:], jnp.array([N], jnp.int32)])
    idx = jnp.arange(N)[None, :]
    member = (idx >= starts[:, None]) & (idx < ends[:, None])
    counts = jnp.maximum(ends - starts, 1)
    bag = member.astype(jnp.float32) / counts[:, None]
    t_ref = ent_emb @ wt + bt
    ne_ref = bag @ nbr_ent
    nr_ref = bag @ nbr_rel
    n_ref = jnp.concatenate([ne_ref, nr_ref], -1) @ wn + bn
    node_ref = jnp.maximum(t_ref + n_ref, 0.0).reshape(B, 2 * H)
    pair_ref = jnp.maximum(node_ref @ wr + br, 0.0)
    score_ref = pair_ref @ wp + bp

    # Kernel uses bf16 MXU inputs with f32 accumulation -> relaxed tolerance
    # vs. the pure-f32 PyTorch-style reference.
    np.testing.assert_allclose(np.asarray(pair), np.asarray(pair_ref),
                               rtol=2e-2, atol=2e-2)
    np.testing.assert_allclose(np.asarray(scores), np.asarray(score_ref),
                               rtol=2e-2, atol=2e-2)

    print("KERNEL_OK")
</pallas_src>

<mosaic_0001>
module attributes {stable_mosaic.version = 11 : i64} {
  func.func @summary_kernel(%arg0: i32, %arg1: memref<4x32xbf16, #tpu.memory_space<vmem>>, %arg2: memref<16x64xbf16, #tpu.memory_space<vmem>>, %arg3: memref<4x1xi32, #tpu.memory_space<vmem>>, %arg4: memref<4x1xi32, #tpu.memory_space<vmem>>, %arg5: memref<4x1xf32, #tpu.memory_space<vmem>>, %arg6: memref<32x32xbf16, #tpu.memory_space<vmem>>, %arg7: memref<64x32xbf16, #tpu.memory_space<vmem>>, %arg8: memref<1x32xf32, #tpu.memory_space<vmem>>, %arg9: memref<32x32xbf16, #tpu.memory_space<vmem>>, %arg10: memref<32x32xbf16, #tpu.memory_space<vmem>>, %arg11: memref<1x32xf32, #tpu.memory_space<vmem>>, %arg12: memref<32x8xbf16, #tpu.memory_space<vmem>>, %arg13: memref<1x8xf32, #tpu.memory_space<vmem>>, %arg14: memref<2x128xf32, #tpu.memory_space<vmem>>) attributes {dimension_semantics = [#tpu.dimension_semantics<parallel>], iteration_bounds = array<i64: 1>, scalar_prefetch = 0 : i64, scratch_operands = 0 : i64, tpu.core_type = #tpu.core_type<tc>, window_params = [{transform_indices = @transform_0, window_bounds = array<i64: 4, 32>}, {transform_indices = @transform_1, window_bounds = array<i64: 16, 64>}, {transform_indices = @transform_2, window_bounds = array<i64: 4, 1>}, {transform_indices = @transform_3, window_bounds = array<i64: 4, 1>}, {transform_indices = @transform_4, window_bounds = array<i64: 4, 1>}, {pipeline_mode = #tpu.pipeline_mode<synchronous>, transform_indices = @transform_5, window_bounds = array<i64: 32, 32>}, {pipeline_mode = #tpu.pipeline_mode<synchronous>, transform_indices = @transform_6, window_bounds = array<i64: 64, 32>}, {pipeline_mode = #tpu.pipeline_mode<synchronous>, transform_indices = @transform_7, window_bounds = array<i64: 1, 32>}, {pipeline_mode = #tpu.pipeline_mode<synchronous>, transform_indices = @transform_8, window_bounds = array<i64: 32, 32>}, {pipeline_mode = #tpu.pipeline_mode<synchronous>, transform_indices = @transform_9, window_bounds = array<i64: 32, 32>}, {pipeline_mode = #tpu.pipeline_mode<synchronous>, transform_indices = @transform_10, window_bounds = array<i64: 1, 32>}, {pipeline_mode = #tpu.pipeline_mode<synchronous>, transform_indices = @transform_11, window_bounds = array<i64: 32, 8>}, {pipeline_mode = #tpu.pipeline_mode<synchronous>, transform_indices = @transform_12, window_bounds = array<i64: 1, 8>}, {transform_indices = @transform_13, window_bounds = array<i64: 2, 128>}]} {
    %0 = tpu.iota {dimensions = array<i32: 1>} : vector<4x16xi32>
    %c0 = arith.constant 0 : index
    %c0_0 = arith.constant 0 : index
    %1 = vector.load %arg3[%c0, %c0_0] : memref<4x1xi32, #tpu.memory_space<vmem>>, vector<4x1xi32>
    %2 = vector.broadcast %1 : vector<4x1xi32> to vector<4x16xi32>
    %3 = arith.cmpi sge, %0, %2 : vector<4x16xi32>
    %c0_1 = arith.constant 0 : index
    %c0_2 = arith.constant 0 : index
    %4 = vector.load %arg4[%c0_1, %c0_2] : memref<4x1xi32, #tpu.memory_space<vmem>>, vector<4x1xi32>
    %5 = vector.broadcast %4 : vector<4x1xi32> to vector<4x16xi32>
    %6 = arith.cmpi slt, %0, %5 : vector<4x16xi32>
    %7 = arith.andi %3, %6 : vector<4x16xi1>
    %cst = arith.constant 1.000000e+00 : f32
    %cst_3 = arith.constant 0.000000e+00 : f32
    %8 = vector.broadcast %cst : f32 to vector<4x16xf32>
    %9 = vector.broadcast %cst_3 : f32 to vector<4x16xf32>
    %10 = arith.select %7, %8, %9 : vector<4x16xi1>, vector<4x16xf32>
    %11 = arith.truncf %10 : vector<4x16xf32> to vector<4x16xbf16>
    %c0_4 = arith.constant 0 : index
    %c0_5 = arith.constant 0 : index
    %12 = vector.load %arg2[%c0_4, %c0_5] : memref<16x64xbf16, #tpu.memory_space<vmem>>, vector<16x64xbf16>
    %cst_6 = arith.constant dense<0.000000e+00> : vector<4x64xf32>
    %13 = tpu.matmul %11, %12, %cst_6 {dimension_numbers = #tpu.dot_dimension_numbers<[1], [0], [0], [1], [0, 0, 1, 1], [], []>} : vector<4x16xbf16>, vector<16x64xbf16>, vector<4x64xf32> -> vector<4x64xf32>
    %c0_7 = arith.constant 0 : index
    %c0_8 = arith.constant 0 : index
    %14 = vector.load %arg5[%c0_7, %c0_8] : memref<4x1xf32, #tpu.memory_space<vmem>>, vector<4x1xf32>
    %15 = vector.broadcast %14 : vector<4x1xf32> to vector<4x64xf32>
    %16 = arith.mulf %13, %15 : vector<4x64xf32>
    %c0_9 = arith.constant 0 : index
    %c0_10 = arith.constant 0 : index
    %17 = vector.load %arg1[%c0_9, %c0_10] : memref<4x32xbf16, #tpu.memory_space<vmem>>, vector<4x32xbf16>
    %c0_11 = arith.constant 0 : index
    %c0_12 = arith.constant 0 : index
    %18 = vector.load %arg6[%c0_11, %c0_12] : memref<32x32xbf16, #tpu.memory_space<vmem>>, vector<32x32xbf16>
    %cst_13 = arith.constant dense<0.000000e+00> : vector<4x32xf32>
    %19 = tpu.matmul %17, %18, %cst_13 {dimension_numbers = #tpu.dot_dimension_numbers<[1], [0], [0], [1], [0, 0, 1, 1], [], []>} : vector<4x32xbf16>, vector<32x32xbf16>, vector<4x32xf32> -> vector<4x32xf32>
    %20 = arith.truncf %16 : vector<4x64xf32> to vector<4x64xbf16>
    %c0_14 = arith.constant 0 : index
    %c0_15 = arith.constant 0 : index
    %21 = vector.load %arg7[%c0_14, %c0_15] : memref<64x32xbf16, #tpu.memory_space<vmem>>, vector<64x32xbf16>
    %cst_16 = arith.constant dense<0.000000e+00> : vector<4x32xf32>
    %22 = tpu.matmul %20, %21, %cst_16 {dimension_numbers = #tpu.dot_dimension_numbers<[1], [0], [0], [1], [0, 0, 1, 1], [], []>} : vector<4x64xbf16>, vector<64x32xbf16>, vector<4x32xf32> -> vector<4x32xf32>
    %23 = arith.addf %19, %22 : vector<4x32xf32>
    %c0_17 = arith.constant 0 : index
    %c0_18 = arith.constant 0 : index
    %24 = vector.load %arg8[%c0_17, %c0_18] : memref<1x32xf32, #tpu.memory_space<vmem>>, vector<1x32xf32>
    %25 = vector.broadcast %24 : vector<1x32xf32> to vector<4x32xf32>
    %26 = arith.addf %23, %25 : vector<4x32xf32>
    %cst_19 = arith.constant 0.000000e+00 : f32
    %27 = vector.broadcast %cst_19 : f32 to vector<4x32xf32>
    %28 = arith.maximumf %26, %27 : vector<4x32xf32>
    %29 = vector.extract_strided_slice %28 {offsets = [0, 0], sizes = [2, 32], strides = [1, 1]} : vector<4x32xf32> to vector<2x32xf32>
    %30 = arith.truncf %29 : vector<2x32xf32> to vector<2x32xbf16>
    %31 = vector.extract_strided_slice %28 {offsets = [2, 0], sizes = [2, 32], strides = [1, 1]} : vector<4x32xf32> to vector<2x32xf32>
    %32 = arith.truncf %31 : vector<2x32xf32> to vector<2x32xbf16>
    %c0_20 = arith.constant 0 : index
    %c0_21 = arith.constant 0 : index
    %33 = vector.load %arg9[%c0_20, %c0_21] : memref<32x32xbf16, #tpu.memory_space<vmem>>, vector<32x32xbf16>
    %cst_22 = arith.constant dense<0.000000e+00> : vector<2x32xf32>
    %34 = tpu.matmul %30, %33, %cst_22 {dimension_numbers = #tpu.dot_dimension_numbers<[1], [0], [0], [1], [0, 0, 1, 1], [], []>} : vector<2x32xbf16>, vector<32x32xbf16>, vector<2x32xf32> -> vector<2x32xf32>
    %c0_23 = arith.constant 0 : index
    %c0_24 = arith.constant 0 : index
    %35 = vector.load %arg10[%c0_23, %c0_24] : memref<32x32xbf16, #tpu.memory_space<vmem>>, vector<32x32xbf16>
    %cst_25 = arith.constant dense<0.000000e+00> : vector<2x32xf32>
    %36 = tpu.matmul %32, %35, %cst_25 {dimension_numbers = #tpu.dot_dimension_numbers<[1], [0], [0], [1], [0, 0, 1, 1], [], []>} : vector<2x32xbf16>, vector<32x32xbf16>, vector<2x32xf32> -> vector<2x32xf32>
    %37 = arith.addf %34, %36 : vector<2x32xf32>
    %c0_26 = arith.constant 0 : index
    %c0_27 = arith.constant 0 : index
    %38 = vector.load %arg11[%c0_26, %c0_27] : memref<1x32xf32, #tpu.memory_space<vmem>>, vector<1x32xf32>
    %39 = vector.broadcast %38 : vector<1x32xf32> to vector<2x32xf32>
    %40 = arith.addf %37, %39 : vector<2x32xf32>
    %cst_28 = arith.constant 0.000000e+00 : f32
    %41 = vector.broadcast %cst_28 : f32 to vector<2x32xf32>
    %42 = arith.maximumf %40, %41 : vector<2x32xf32>
    %43 = arith.truncf %42 : vector<2x32xf32> to vector<2x32xbf16>
    %c0_29 = arith.constant 0 : index
    %c0_30 = arith.constant 0 : index
    %44 = vector.load %arg12[%c0_29, %c0_30] : memref<32x8xbf16, #tpu.memory_space<vmem>>, vector<32x8xbf16>
    %cst_31 = arith.constant dense<0.000000e+00> : vector<2x8xf32>
    %45 = tpu.matmul %43, %44, %cst_31 {dimension_numbers = #tpu.dot_dimension_numbers<[1], [0], [0], [1], [0, 0, 1, 1], [], []>} : vector<2x32xbf16>, vector<32x8xbf16>, vector<2x8xf32> -> vector<2x8xf32>
    %c0_32 = arith.constant 0 : index
    %c0_33 = arith.constant 0 : index
    %46 = vector.load %arg13[%c0_32, %c0_33] : memref<1x8xf32, #tpu.memory_space<vmem>>, vector<1x8xf32>
    %47 = vector.broadcast %46 : vector<1x8xf32> to vector<2x8xf32>
    %48 = arith.addf %45, %47 : vector<2x8xf32>
    %cst_34 = arith.constant 0.000000e+00 : f32
    %49 = vector.broadcast %cst_34 : f32 to vector<2x88xf32>
    %50 = tpu.concatenate %42, %48, %49 in 1 : vector<2x32xf32>, vector<2x8xf32>, vector<2x88xf32> -> vector<2x128xf32>
    %c0_35 = arith.constant 0 : index
    %c0_36 = arith.constant 0 : index
    %51 = vector.load %arg14[%c0_35, %c0_36] : memref<2x128xf32, #tpu.memory_space<vmem>>, vector<2x128xf32>
    tpu.vector_store %arg14[%c0_35, %c0_36], %50 {strides = array<i32>} : memref<2x128xf32, #tpu.memory_space<vmem>>, vector<2x128xf32>,
    return
  }
  func.func @transform_0(%arg0: i32) -> (i32, i32) {
    %c0_i32 = arith.constant 0 : i32
    %c0_i32_0 = arith.constant 0 : i32
    return %arg0, %c0_i32 : i32, i32
  }
  func.func @transform_1(%arg0: i32) -> (i32, i32) {
    %c0_i32 = arith.constant 0 : i32
    %c0_i32_0 = arith.constant 0 : i32
    return %arg0, %c0_i32 : i32, i32
  }
  func.func @transform_2(%arg0: i32) -> (i32, i32) {
    %c0_i32 = arith.constant 0 : i32
    %c0_i32_0 = arith.constant 0 : i32
    return %arg0, %c0_i32 : i32, i32
  }
  func.func @transform_3(%arg0: i32) -> (i32, i32) {
    %c0_i32 = arith.constant 0 : i32
    %c0_i32_0 = arith.constant 0 : i32
    return %arg0, %c0_i32 : i32, i32
  }
  func.func @transform_4(%arg0: i32) -> (i32, i32) {
    %c0_i32 = arith.constant 0 : i32
    %c0_i32_0 = arith.constant 0 : i32
    return %arg0, %c0_i32 : i32, i32
  }
  func.func @transform_5(%arg0: i32) -> (i32, i32) {
    %c0_i32 = arith.constant 0 : i32
    %c0_i32_0 = arith.constant 0 : i32
    %c0_i32_1 = arith.constant 0 : i32
    return %c0_i32, %c0_i32_0 : i32, i32
  }
  func.func @transform_6(%arg0: i32) -> (i32, i32) {
    %c0_i32 = arith.constant 0 : i32
    %c0_i32_0 = arith.constant 0 : i32
    %c0_i32_1 = arith.constant 0 : i32
    return %c0_i32, %c0_i32_0 : i32, i32
  }
  func.func @transform_7(%arg0: i32) -> (i32, i32) {
    %c0_i32 = arith.constant 0 : i32
    %c0_i32_0 = arith.constant 0 : i32
    %c0_i32_1 = arith.constant 0 : i32
    return %c0_i32, %c0_i32_0 : i32, i32
  }
  func.func @transform_8(%arg0: i32) -> (i32, i32) {
    %c0_i32 = arith.constant 0 : i32
    %c0_i32_0 = arith.constant 0 : i32
    %c0_i32_1 = arith.constant 0 : i32
    return %c0_i32, %c0_i32_0 : i32, i32
  }
  func.func @transform_9(%arg0: i32) -> (i32, i32) {
    %c0_i32 = arith.constant 0 : i32
    %c0_i32_0 = arith.constant 0 : i32
    %c0_i32_1 = arith.constant 0 : i32
    return %c0_i32, %c0_i32_0 : i32, i32
  }
  func.func @transform_10(%arg0: i32) -> (i32, i32) {
    %c0_i32 = arith.constant 0 : i32
    %c0_i32_0 = arith.constant 0 : i32
    %c0_i32_1 = arith.constant 0 : i32
    return %c0_i32, %c0_i32_0 : i32, i32
  }
  func.func @transform_11(%arg0: i32) -> (i32, i32) {
    %c0_i32 = arith.constant 0 : i32
    %c0_i32_0 = arith.constant 0 : i32
    %c0_i32_1 = arith.constant 0 : i32
    return %c0_i32, %c0_i32_0 : i32, i32
  }
  func.func @transform_12(%arg0: i32) -> (i32, i32) {
    %c0_i32 = arith.constant 0 : i32
    %c0_i32_0 = arith.constant 0 : i32
    %c0_i32_1 = arith.constant 0 : i32
    return %c0_i32, %c0_i32_0 : i32, i32
  }
  func.func @transform_13(%arg0: i32) -> (i32, i32) {
    %c0_i32 = arith.constant 0 : i32
    %c0_i32_0 = arith.constant 0 : i32
    return %arg0, %c0_i32 : i32, i32
  }
}

module attributes {stable_mosaic.version = 11 : i64} {
  func.func @summary_kernel(%arg0: i32, %arg1: memref<4x32xbf16, #tpu.memory_space<vmem>>, %arg2: memref<16x64xbf16, #tpu.memory_space<vmem>>, %arg3: memref<4x1xi32, #tpu.memory_space<vmem>>, %arg4: memref<4x1xi32, #tpu.memory_space<vmem>>, %arg5: memref<4x1xf32, #tpu.memory_space<vmem>>, %arg6: memref<32x32xbf16, #tpu.memory_space<vmem>>, %arg7: memref<64x32xbf16, #tpu.memory_space<vmem>>, %arg8: memref<1x32xf32, #tpu.memory_space<vmem>>, %arg9: memref<32x32xbf16, #tpu.memory_space<vmem>>, %arg10: memref<32x32xbf16, #tpu.memory_space<vmem>>, %arg11: memref<1x32xf32, #tpu.memory_space<vmem>>, %arg12: memref<32x8xbf16, #tpu.memory_space<vmem>>, %arg13: memref<1x8xf32, #tpu.memory_space<vmem>>, %arg14: memref<2x128xf32, #tpu.memory_space<vmem>>) attributes {dimension_semantics = [#tpu.dimension_semantics<parallel>], iteration_bounds = array<i64: 1>, scalar_prefetch = 0 : i64, scratch_operands = 0 : i64, tpu.core_type = #tpu.core_type<tc>, window_params = [{transform_indices = @transform_0, window_bounds = array<i64: 4, 32>}, {transform_indices = @transform_1, window_bounds = array<i64: 16, 64>}, {transform_indices = @transform_2, window_bounds = array<i64: 4, 1>}, {transform_indices = @transform_3, window_bounds = array<i64: 4, 1>}, {transform_indices = @transform_4, window_bounds = array<i64: 4, 1>}, {pipeline_mode = #tpu.pipeline_mode<synchronous>, transform_indices = @transform_5, window_bounds = array<i64: 32, 32>}, {pipeline_mode = #tpu.pipeline_mode<synchronous>, transform_indices = @transform_6, window_bounds = array<i64: 64, 32>}, {pipeline_mode = #tpu.pipeline_mode<synchronous>, transform_indices = @transform_7, window_bounds = array<i64: 1, 32>}, {pipeline_mode = #tpu.pipeline_mode<synchronous>, transform_indices = @transform_8, window_bounds = array<i64: 32, 32>}, {pipeline_mode = #tpu.pipeline_mode<synchronous>, transform_indices = @transform_9, window_bounds = array<i64: 32, 32>}, {pipeline_mode = #tpu.pipeline_mode<synchronous>, transform_indices = @transform_10, window_bounds = array<i64: 1, 32>}, {pipeline_mode = #tpu.pipeline_mode<synchronous>, transform_indices = @transform_11, window_bounds = array<i64: 32, 8>}, {pipeline_mode = #tpu.pipeline_mode<synchronous>, transform_indices = @transform_12, window_bounds = array<i64: 1, 8>}, {transform_indices = @transform_13, window_bounds = array<i64: 2, 128>}]} {
    %0 = tpu.iota {dimensions = array<i32: 1>} : vector<4x16xi32>
    %c0 = arith.constant 0 : index
    %c0_0 = arith.constant 0 : index
    %1 = vector.load %arg3[%c0, %c0_0] : memref<4x1xi32, #tpu.memory_space<vmem>>, vector<4x1xi32>
    %2 = vector.broadcast %1 : vector<4x1xi32> to vector<4x16xi32>
    %3 = arith.cmpi sge, %0, %2 : vector<4x16xi32>
    %c0_1 = arith.constant 0 : index
    %c0_2 = arith.constant 0 : index
    %4 = vector.load %arg4[%c0_1, %c0_2] : memref<4x1xi32, #tpu.memory_space<vmem>>, vector<4x1xi32>
    %5 = vector.broadcast %4 : vector<4x1xi32> to vector<4x16xi32>
    %6 = arith.cmpi slt, %0, %5 : vector<4x16xi32>
    %7 = arith.andi %3, %6 : vector<4x16xi1>
    %cst = arith.constant 1.000000e+00 : f32
    %cst_3 = arith.constant 0.000000e+00 : f32
    %8 = vector.broadcast %cst : f32 to vector<4x16xf32>
    %9 = vector.broadcast %cst_3 : f32 to vector<4x16xf32>
    %10 = arith.select %7, %8, %9 : vector<4x16xi1>, vector<4x16xf32>
    %11 = arith.truncf %10 : vector<4x16xf32> to vector<4x16xbf16>
    %c0_4 = arith.constant 0 : index
    %c0_5 = arith.constant 0 : index
    %12 = vector.load %arg2[%c0_4, %c0_5] : memref<16x64xbf16, #tpu.memory_space<vmem>>, vector<16x64xbf16>
    %cst_6 = arith.constant dense<0.000000e+00> : vector<4x64xf32>
    %13 = tpu.matmul %11, %12, %cst_6 {dimension_numbers = #tpu.dot_dimension_numbers<[1], [0], [0], [1], [0, 0, 1, 1], [], []>} : vector<4x16xbf16>, vector<16x64xbf16>, vector<4x64xf32> -> vector<4x64xf32>
    %c0_7 = arith.constant 0 : index
    %c0_8 = arith.constant 0 : index
    %14 = vector.load %arg5[%c0_7, %c0_8] : memref<4x1xf32, #tpu.memory_space<vmem>>, vector<4x1xf32>
    %15 = vector.broadcast %14 : vector<4x1xf32> to vector<4x64xf32>
    %16 = arith.mulf %13, %15 : vector<4x64xf32>
    %c0_9 = arith.constant 0 : index
    %c0_10 = arith.constant 0 : index
    %17 = vector.load %arg1[%c0_9, %c0_10] : memref<4x32xbf16, #tpu.memory_space<vmem>>, vector<4x32xbf16>
    %c0_11 = arith.constant 0 : index
    %c0_12 = arith.constant 0 : index
    %18 = vector.load %arg6[%c0_11, %c0_12] : memref<32x32xbf16, #tpu.memory_space<vmem>>, vector<32x32xbf16>
    %cst_13 = arith.constant dense<0.000000e+00> : vector<4x32xf32>
    %19 = tpu.matmul %17, %18, %cst_13 {dimension_numbers = #tpu.dot_dimension_numbers<[1], [0], [0], [1], [0, 0, 1, 1], [], []>} : vector<4x32xbf16>, vector<32x32xbf16>, vector<4x32xf32> -> vector<4x32xf32>
    %20 = arith.truncf %16 : vector<4x64xf32> to vector<4x64xbf16>
    %c0_14 = arith.constant 0 : index
    %c0_15 = arith.constant 0 : index
    %21 = vector.load %arg7[%c0_14, %c0_15] : memref<64x32xbf16, #tpu.memory_space<vmem>>, vector<64x32xbf16>
    %cst_16 = arith.constant dense<0.000000e+00> : vector<4x32xf32>
    %22 = tpu.matmul %20, %21, %cst_16 {dimension_numbers = #tpu.dot_dimension_numbers<[1], [0], [0], [1], [0, 0, 1, 1], [], []>} : vector<4x64xbf16>, vector<64x32xbf16>, vector<4x32xf32> -> vector<4x32xf32>
    %23 = arith.addf %19, %22 : vector<4x32xf32>
    %c0_17 = arith.constant 0 : index
    %c0_18 = arith.constant 0 : index
    %24 = vector.load %arg8[%c0_17, %c0_18] : memref<1x32xf32, #tpu.memory_space<vmem>>, vector<1x32xf32>
    %25 = vector.broadcast %24 : vector<1x32xf32> to vector<4x32xf32>
    %26 = arith.addf %23, %25 : vector<4x32xf32>
    %cst_19 = arith.constant 0.000000e+00 : f32
    %27 = vector.broadcast %cst_19 : f32 to vector<4x32xf32>
    %28 = arith.maximumf %26, %27 : vector<4x32xf32>
    %29 = vector.extract_strided_slice %28 {offsets = [0, 0], sizes = [2, 32], strides = [1, 1]} : vector<4x32xf32> to vector<2x32xf32>
    %30 = arith.truncf %29 : vector<2x32xf32> to vector<2x32xbf16>
    %31 = vector.extract_strided_slice %28 {offsets = [2, 0], sizes = [2, 32], strides = [1, 1]} : vector<4x32xf32> to vector<2x32xf32>
    %32 = arith.truncf %31 : vector<2x32xf32> to vector<2x32xbf16>
    %c0_20 = arith.constant 0 : index
    %c0_21 = arith.constant 0 : index
    %33 = vector.load %arg9[%c0_20, %c0_21] : memref<32x32xbf16, #tpu.memory_space<vmem>>, vector<32x32xbf16>
    %cst_22 = arith.constant dense<0.000000e+00> : vector<2x32xf32>
    %34 = tpu.matmul %30, %33, %cst_22 {dimension_numbers = #tpu.dot_dimension_numbers<[1], [0], [0], [1], [0, 0, 1, 1], [], []>} : vector<2x32xbf16>, vector<32x32xbf16>, vector<2x32xf32> -> vector<2x32xf32>
    %c0_23 = arith.constant 0 : index
    %c0_24 = arith.constant 0 : index
    %35 = vector.load %arg10[%c0_23, %c0_24] : memref<32x32xbf16, #tpu.memory_space<vmem>>, vector<32x32xbf16>
    %cst_25 = arith.constant dense<0.000000e+00> : vector<2x32xf32>
    %36 = tpu.matmul %32, %35, %cst_25 {dimension_numbers = #tpu.dot_dimension_numbers<[1], [0], [0], [1], [0, 0, 1, 1], [], []>} : vector<2x32xbf16>, vector<32x32xbf16>, vector<2x32xf32> -> vector<2x32xf32>
    %37 = arith.addf %34, %36 : vector<2x32xf32>
    %c0_26 = arith.constant 0 : index
    %c0_27 = arith.constant 0 : index
    %38 = vector.load %arg11[%c0_26, %c0_27] : memref<1x32xf32, #tpu.memory_space<vmem>>, vector<1x32xf32>
    %39 = vector.broadcast %38 : vector<1x32xf32> to vector<2x32xf32>
    %40 = arith.addf %37, %39 : vector<2x32xf32>
    %cst_28 = arith.constant 0.000000e+00 : f32
    %41 = vector.broadcast %cst_28 : f32 to vector<2x32xf32>
    %42 = arith.maximumf %40, %41 : vector<2x32xf32>
    %43 = arith.truncf %42 : vector<2x32xf32> to vector<2x32xbf16>
    %c0_29 = arith.constant 0 : index
    %c0_30 = arith.constant 0 : index
    %44 = vector.load %arg12[%c0_29, %c0_30] : memref<32x8xbf16, #tpu.memory_space<vmem>>, vector<32x8xbf16>
    %cst_31 = arith.constant dense<0.000000e+00> : vector<2x8xf32>
    %45 = tpu.matmul %43, %44, %cst_31 {dimension_numbers = #tpu.dot_dimension_numbers<[1], [0], [0], [1], [0, 0, 1, 1], [], []>} : vector<2x32xbf16>, vector<32x8xbf16>, vector<2x8xf32> -> vector<2x8xf32>
    %c0_32 = arith.constant 0 : index
    %c0_33 = arith.constant 0 : index
    %46 = vector.load %arg13[%c0_32, %c0_33] : memref<1x8xf32, #tpu.memory_space<vmem>>, vector<1x8xf32>
    %47 = vector.broadcast %46 : vector<1x8xf32> to vector<2x8xf32>
    %48 = arith.addf %45, %47 : vector<2x8xf32>
    %cst_34 = arith.constant 0.000000e+00 : f32
    %49 = vector.broadcast %cst_34 : f32 to vector<2x88xf32>
    %50 = tpu.concatenate %42, %48, %49 in 1 : vector<2x32xf32>, vector<2x8xf32>, vector<2x88xf32> -> vector<2x128xf32>
    %c0_35 = arith.constant 0 : index
    %c0_36 = arith.constant 0 : index
    %51 = vector.load %arg14[%c0_35, %c0_36] : memref<2x128xf32, #tpu.memory_space<vmem>>, vector<2x128xf32>
    tpu.vector_store %arg14[%c0_35, %c0_36], %50 {strides = array<i32>} : memref<2x128xf32, #tpu.memory_space<vmem>>, vector<2x128xf32>,
    return
  }
  func.func @transform_0(%arg0: i32) -> (i32, i32) {
    %c0_i32 = arith.constant 0 : i32
    %c0_i32_0 = arith.constant 0 : i32
    return %arg0, %c0_i32 : i32, i32
  }
  func.func @transform_1(%arg0: i32) -> (i32, i32) {
    %c0_i32 = arith.constant 0 : i32
    %c0_i32_0 = arith.constant 0 : i32
    return %arg0, %c0_i32 : i32, i32
  }
  func.func @transform_2(%arg0: i32) -> (i32, i32) {
    %c0_i32 = arith.constant 0 : i32
    %c0_i32_0 = arith.constant 0 : i32
    return %arg0, %c0_i32 : i32, i32
  }
  func.func @transform_3(%arg0: i32) -> (i32, i32) {
    %c0_i32 = arith.constant 0 : i32
    %c0_i32_0 = arith.constant 0 : i32
    return %arg0, %c0_i32 : i32, i32
  }
  func.func @transform_4(%arg0: i32) -> (i32, i32) {
    %c0_i32 = arith.constant 0 : i32
    %c0_i32_0 = arith.constant 0 : i32
    return %arg0, %c0_i32 : i32, i32
  }
  func.func @transform_5(%arg0: i32) -> (i32, i32) {
    %c0_i32 = arith.constant 0 : i32
    %c0_i32_0 = arith.constant 0 : i32
    %c0_i32_1 = arith.constant 0 : i32
    return %c0_i32, %c0_i32_0 : i32, i32
  }
  func.func @transform_6(%arg0: i32) -> (i32, i32) {
    %c0_i32 = arith.constant 0 : i32
    %c0_i32_0 = arith.constant 0 : i32
    %c0_i32_1 = arith.constant 0 : i32
    return %c0_i32, %c0_i32_0 : i32, i32
  }
  func.func @transform_7(%arg0: i32) -> (i32, i32) {
    %c0_i32 = arith.constant 0 : i32
    %c0_i32_0 = arith.constant 0 : i32
    %c0_i32_1 = arith.constant 0 : i32
    return %c0_i32, %c0_i32_0 : i32, i32
  }
  func.func @transform_8(%arg0: i32) -> (i32, i32) {
    %c0_i32 = arith.constant 0 : i32
    %c0_i32_0 = arith.constant 0 : i32
    %c0_i32_1 = arith.constant 0 : i32
    return %c0_i32, %c0_i32_0 : i32, i32
  }
  func.func @transform_9(%arg0: i32) -> (i32, i32) {
    %c0_i32 = arith.constant 0 : i32
    %c0_i32_0 = arith.constant 0 : i32
    %c0_i32_1 = arith.constant 0 : i32
    return %c0_i32, %c0_i32_0 : i32, i32
  }
  func.func @transform_10(%arg0: i32) -> (i32, i32) {
    %c0_i32 = arith.constant 0 : i32
    %c0_i32_0 = arith.constant 0 : i32
    %c0_i32_1 = arith.constant 0 : i32
    return %c0_i32, %c0_i32_0 : i32, i32
  }
  func.func @transform_11(%arg0: i32) -> (i32, i32) {
    %c0_i32 = arith.constant 0 : i32
    %c0_i32_0 = arith.constant 0 : i32
    %c0_i32_1 = arith.constant 0 : i32
    return %c0_i32, %c0_i32_0 : i32, i32
  }
  func.func @transform_12(%arg0: i32) -> (i32, i32) {
    %c0_i32 = arith.constant 0 : i32
    %c0_i32_0 = arith.constant 0 : i32
    %c0_i32_1 = arith.constant 0 : i32
    return %c0_i32, %c0_i32_0 : i32, i32
  }
  func.func @transform_13(%arg0: i32) -> (i32, i32) {
    %c0_i32 = arith.constant 0 : i32
    %c0_i32_0 = arith.constant 0 : i32
    return %arg0, %c0_i32 : i32, i32
  }
}

</mosaic_0001>

<bundles_post_ra>
// kernel: tpu_custom_call.1
= control target key start
LH: loop header
LB: loop body
LE: loop exit
PB: predicated region body
PF: predicated region fallthrough
CT: control target
= control target key end

     0   :  { %v621_v1 = vmov 0   ;;  %v622_v3 = vmov 0.0   ;;  %vm623_vm0 = vmmov 0   ;;  %s799_s0 = inlined_call_operand.vmem [shape: bf16[4,32], index: 0, kind: input, shape index: {}]   ;;  %s800_s1 = inlined_call_operand.vmem [shape: bf16[16,64], index: 1, kind: input, shape index: {}]   ;;  %s801_s2 = inlined_call_operand.vmem [shape: s32[4,1], index: 2, kind: input, shape index: {}]   ;;  %s802_s3 = inlined_call_operand.vmem [shape: s32[4,1], index: 3, kind: input, shape index: {}]   ;;  %s803_s4 = inlined_call_operand.vmem [shape: f32[4,1], index: 4, kind: input, shape index: {}]   ;;  %s804_s5 = inlined_call_operand.vmem [shape: bf16[32,32], index: 5, kind: input, shape index: {}]   ;;  %s805_s6 = inlined_call_operand.vmem [shape: bf16[64,32], index: 6, kind: input, shape index: {}]   ;;  %s806_s7 = inlined_call_operand.vmem [shape: f32[1,32], index: 7, kind: input, shape index: {}]   ;;  %s807_s8 = inlined_call_operand.vmem [shape: bf16[32,32], index: 8, kind: input, shape index: {}]   ;;  %s808_s9 = inlined_call_operand.vmem [shape: bf16[32,32], index: 9, kind: input, shape index: {}]   ;;  %s809_s10 = inlined_call_operand.vmem [shape: f32[1,32], index: 10, kind: input, shape index: {}]   ;;  %s810_s11 = inlined_call_operand.vmem [shape: bf16[32,8], index: 11, kind: input, shape index: {}]   ;;  %s811_s12 = inlined_call_operand.vmem [shape: f32[1,8], index: 12, kind: input, shape index: {}]   ;;  %s812_s13 = inlined_call_operand.hbm [shape: f32[2,128], index: 13, kind: output, shape index: {}]  }
   0x1   :  { %v48_v0 = vld [vmem:[%s801_s2] sm:$0xf]  ;;  %582 = vset.pattern.permute.xlu0 %v621_v1  ;;  %583 = vset.pattern.permute.xlu1 %v621_v1 }
   0x2   :  { %v53_v2 = vld [vmem:[%s802_s3] sm:$0xf]  ;;  %50 = vperm.xlu0 %582, %v48_v0   ;;  %527 = vmatprep.subr.bf16.mxu0 %v622_v3 }
   0x3   :  { %533 = vmatprep.subr.bf16.mxu1 %v622_v3  ;;  %v584_v4 = vld [vmem:[%s800_s1] sm:$0xff]   ;;  %529 = vmatprep.mubr.msk.bf16.mxu0 %vm623_vm0, %v622_v3 }
   0x4   :  { %528 = vmatpush3.bf16.msra.mxu0 %v584_v4  ;;  %541 = vmatprep.mubr.msk.bf16.mxu1 %vm623_vm0, %v622_v3 }
   0x5   :  { %545 = vmatprep.subr.bf16.mxu0 %v622_v3 }
   0x6   :  { %55 = vperm.xlu0 %582, %v53_v2  }
   0x7   :  { %18 = vsyncpa [#allocation3], 0  ;;  %v113_v5 = vld [vmem:[%s803_s4] sm:$0xf]  ;;  %v586_v7 = vld [vmem:[%s805_s6 + $0x8] sm:$0xff]   ;;  %v46_v9 = vlaneseq  ;;  %vm69_vm4 = vcmask 130048  }
   0x8   :  { %v585_v6 = vld [vmem:[%s805_s6] sm:$0xff]   ;;  %116 = vperm.xlu1 %583, %v113_v5   ;;  %v588_v8 = vld [vmem:[%s805_s6 + $0x10] sm:$0xff]   ;;  %v589_v16 = vld [vmem:[%s804_s5 + $0x8] sm:$0xff]   ;;  %vm214_vm5 = vcmask 261120   ;;  %vm158_vm6 = vcmask 523264   ;;  %s625_s17 = smov [#allocation2]  }
   0x9   :  { %534 = vmatpush3.bf16.msra.mxu1 %v585_v6  ;;  %v47_v11 = vand.u32 127, %v46_v9  ;;  %v587_v14 = vld [vmem:[%s804_s5] sm:$0xff]   ;;  %v590_v17 = vld [vmem:[%s805_s6 + $0x18] sm:$0xff]   ;;  %v593_v32 = vld [vmem:[%s807_s8 + $0x8] sm:$0xff]   ;;  %s478_s18 = sshll.u32 %s625_s17, 4  ;;  %vm469_vm7 = vcmask 326656   ;;  %s479_s18 = int_to_ptr.vmem [resolvable:$true] %s478_s18 }
   0xa   :  { %535 = vmatprep.subr.bf16.mxu1 %v622_v3  ;;  %v120_v18 = vld [vmem:[%s799_s0] sm:$0x3]  ;;  %v594_v33 = vld [vmem:[%s808_s9 + $0x8] sm:$0xff]   ;;  %s597_s4 = scalar_lea.vmem %s479_s18, 32  ;;  %p602_p1 = scmp.lt.s32.totalorder %s479_s18, %s479_s18 }
   0xb   :  { %v591_v30 = vld [vmem:[%s807_s8] sm:$0xff]   ;;  %v596_v45 = vld [vmem:[%s810_s11 + $0x8] sm:$0xff]   ;;  %p598_p0 = scmp.ne.s32.totalorder %s479_s18, %s597_s4  ;;  %p603_p2 = scmp.lt.s32.totalorder %s597_s4, %s597_s4 }
   0xc   :  { %v592_v31 = vld [vmem:[%s808_s9] sm:$0xff]  }
   0xd   :  { %536 = vmatpush3.bf16.msra.mxu1 %v586_v7  ;;  %v496_v35 = vld [vmem:[%s806_s7] ss:$0 sm:$0xff]  ;;  %p604_p3 = por %p603_p2, %p602_p1 }
   0xe   :  { %537 = vmatprep.subr.bf16.mxu1 %v622_v3  ;;  %v595_v44 = vld [vmem:[%s810_s11] sm:$0xff]  }
   0xf   :  { %v503_v49 = vld [vmem:[%s809_s10] ss:$0 sm:$0xff]  ;;  %s624_s10 = smov 32   ;;  %p605_p4 = pnand %p604_p3, %p598_p0 }
  0x10   :  { %v504_v59 = vld [vmem:[%s811_s12] ss:$0 sm:$0xff] }
  0x11   :  { %538 = vmatpush3.bf16.msra.mxu1 %v588_v8 }
  0x12   :  { %539 = vmatprep.subr.bf16.mxu1 %v622_v3 }
  0x15   :  { %540 = vmatpush3.bf16.msra.mxu1 %v590_v17 }
  0x16   :  { %561 = vmatprep.subr.bf16.mxu1 %v622_v3 }
  0x81   :  { %v51_v10 = vpop.permute.xlu0 %50 }
  0x82   :  { %vm52_vm1 = vcmp.ge.s32.totalorder %v47_v11, %v51_v10 }
  0x85   :  { %v56_v12 = vpop.permute.xlu0 %55 }
  0x86   :  { %vm57_vm2 = vcmp.lt.s32.totalorder %v47_v11, %v56_v12 }
  0x87   :  { %vm58_vm3 = vmand %vm52_vm1, %vm57_vm2  ;;  %v117_v19 = vpop.permute.xlu1 %116 }
  0x88   :  { %v59_v13 = vsel %vm58_vm3, 1.0, %v622_v3 }
  0x89   :  { %v60_v15 = vpack.c.bf16 %v59_v13, %v59_v13 }
  0x8b   :  { %530 = vmatmul.mubr.msk.bf16.vlgmr.msra.gmra.mrb[0].mxu0 %vm69_vm4, %v60_v15 }
  0x8c   :  { %546 = vmatpush3.bf16.msra.mxu0 %v587_v14  ;;  %549 = vmatprep.mubr.msk.bf16.mxu0 %vm623_vm0, %v622_v3 }
  0x8d   :  { %547 = vmatprep.subr.bf16.mxu0 %v622_v3 }
  0x90   :  { %548 = vmatpush3.bf16.msra.mxu0 %v589_v16 }
  0x91   :  { %553 = vmatprep.subr.bf16.mxu0 %v622_v3 }
  0x93   :  { %550 = vmatmul.mubr.msk.bf16.vlgmr.msra.gmra.mrb[4].mxu0 %vm214_vm5, %v120_v18 }
  0x94   :  { %557 = vmatprep.mubr.msk.bf16.mxu0 %vm623_vm0, %v622_v3  ;;  %554 = vmatpush3.bf16.msra.mxu0 %v592_v31 }
  0x95   :  { %555 = vmatprep.subr.bf16.mxu0 %v622_v3 }
  0x98   :  { %556 = vmatpush3.bf16.msra.mxu0 %v594_v33 }
  0x99   :  { %569 = vmatprep.subr.bf16.mxu0 %v622_v3 }
 0x15e   :  { %v107_v20 = vpop.f32.mrb[0].mxu0 }
 0x15f   :  { %v119_v21 = vmul.f32 %v117_v19, %v107_v20  ;;  %v531_v22 = vpop.f32.mrb[1].mxu0 }
 0x160   :  { %v110_v23 = vpop.f32.mrb[2].mxu0 }
 0x161   :  { %v125_v24 = vpack.c.bf16 %v119_v21, %v119_v21  ;;  %v532_v25 = vpop.f32.mrb[3].mxu0 }
 0x163   :  { %542 = vmatmul.mubr.msk.bf16.vlgmr.msra.gmra.mrb[0].mxu1 %vm158_vm6, %v125_v24 }
 0x164   :  { %565 = vmatprep.mubr.msk.bf16.mxu1 %vm623_vm0, %v622_v3  ;;  %562 = vmatpush3.bf16.msra.mxu1 %v591_v30 }
 0x165   :  { %563 = vmatprep.subr.bf16.mxu1 %v622_v3 }
 0x166   :  { %v252_v26 = vpop.f32.mrb[4].mxu0 }
 0x167   :  { %v551_v27 = vpop.f32.mrb[5].mxu0 }
 0x168   :  { %v255_v28 = vpop.f32.mrb[6].mxu0  ;;  %564 = vmatpush3.bf16.msra.mxu1 %v593_v32 }
 0x169   :  { %v552_v29 = vpop.f32.mrb[7].mxu0 }
 0x236   :  { %v196_v34 = vpop.f32.mrb[0].mxu1 }
 0x237   :  { %v253_v36 = vadd.f32 %v252_v26, %v196_v34  ;;  %v543_v37 = vpop.f32.mrb[1].mxu1 }
 0x238   :  { %v199_v38 = vpop.f32.mrb[2].mxu1 }
 0x239   :  { %v265_v39 = vadd.f32 %v496_v35, %v253_v36  ;;  %v544_v40 = vpop.f32.mrb[3].mxu1 }
 0x23b   :  { %v266_v41 = vmax.f32 %v265_v39, 0.0 }
 0x23d   :  { %v267_v42 = vpack.c.bf16 %v266_v41, %v266_v41 }
 0x23f   :  { %v277_v43 = vrot.slane %v267_v42, 1  ;;  %566 = vmatmul.mubr.msk.bf16.vlgmr.msra.gmra.mrb[4].mxu1 %vm214_vm5, %v267_v42 }
 0x241   :  { %558 = vmatmul.mubr.msk.bf16.vlgmr.msra.gmra.mrb[8].mxu0 %vm214_vm5, %v277_v43 }
 0x242   :  { %573 = vmatprep.mubr.msk.bf16.mxu0 %vm623_vm0, %v622_v3  ;;  %570 = vmatpush3.bf16.msra.mxu0 %v595_v44 }
 0x243   :  { %571 = vmatprep.subr.bf16.mxu0 %v622_v3 }
 0x246   :  { %572 = vmatpush3.bf16.msra.mxu0 %v596_v45 }
 0x312   :  { %v382_v46 = vpop.f32.mrb[4].mxu1 }
 0x313   :  { %v567_v47 = vpop.f32.mrb[5].mxu1 }
 0x314   :  { %v327_v48 = vpop.f32.mrb[8].mxu0  ;;  %v385_v50 = vpop.f32.mrb[6].mxu1 }
 0x315   :  { %v383_v51 = vadd.f32 %v382_v46, %v327_v48  ;;  %v559_v52 = vpop.f32.mrb[9].mxu0  ;;  %v568_v53 = vpop.f32.mrb[7].mxu1 }
 0x316   :  { %v330_v54 = vpop.f32.mrb[10].mxu0 }
 0x317   :  { %v395_v55 = vadd.f32 %v503_v49, %v383_v51  ;;  %v560_v56 = vpop.f32.mrb[11].mxu0 }
 0x319   :  { %v396_v57 = vmax.f32 %v395_v55, 0.0 }
 0x31b   :  { %v397_v58 = vpack.c.bf16 %v396_v57, %v396_v57 }
 0x31d   :  { %574 = vmatmul.mubr.msk.bf16.vlgmr.msra.gmra.mrb[12].mxu0 %vm214_vm5, %v397_v58 }
 0x3f0   :  { %v458_v60 = vpop.f32.mrb[12].mxu0 }
 0x3f1   :  { %v459_v61 = vadd.f32 %v504_v59, %v458_v60  ;;  %v575_v62 = vpop.f32.mrb[13].mxu0 }
 0x3f2   :  { %v461_v63 = vpop.f32.mrb[14].mxu0 }
 0x3f3   :  { %465 = vrot.lane.b32.xlu1 %v459_v61, %s624_s10  ;;  %v576_v0 = vpop.f32.mrb[15].mxu0 }
 0x465   :  { %v466_v1 = vpop.permute.xlu1 %465 }
 0x466   :  { %v468_v2 = vsel %vm214_vm5, %v396_v57, %v466_v1 }
 0x467   :  { %v470_v3 = vsel %vm469_vm7, %v468_v2, 0.0 }
 0x468   :  { %471 = vst [vmem:[#allocation2] sm:$0x3] %v470_v3 }
 0x469   :  { %608 = shalt.err (!%p605_p4)
}
 0x46a   :  { %s609_s20 = scalar_lea.hbm %s812_s13, 32 }
 0x46b   :  { %p610_p5 = scmp.ne.s32.totalorder %s812_s13, %s609_s20  ;;  %p613_p6 = scmp.lt.u32.totalorder %s609_s20, %s812_s13 }
 0x46d   :  { %p615_p7 = pnand %p613_p6, %p610_p5 }
 0x46f   :  { %618 = shalt.err (!%p615_p7)
}
 0x470   :  { %481 = dma.vmem_to_hbm [thread:$0]  %s479_s18, 32, %s812_s13, [#allocation3]  }
 0x471   :  { %619 = dma.done.wait [#allocation3], 32  }
 0x472   :  { %620 = vsyncadd [#allocation3], 4294967264 }
 0x473   :  { %485 = vsyncpa [#allocation3], 1 }

// kernel: tpu_custom_call.1
= control target key start
LH: loop header
LB: loop body
LE: loop exit
PB: predicated region body
PF: predicated region fallthrough
CT: control target
= control target key end

     0   :  { %v621_v1 = vmov 0   ;;  %v622_v3 = vmov 0.0   ;;  %vm623_vm0 = vmmov 0   ;;  %s799_s0 = inlined_call_operand.vmem [shape: bf16[4,32], index: 0, kind: input, shape index: {}]   ;;  %s800_s1 = inlined_call_operand.vmem [shape: bf16[16,64], index: 1, kind: input, shape index: {}]   ;;  %s801_s2 = inlined_call_operand.vmem [shape: s32[4,1], index: 2, kind: input, shape index: {}]   ;;  %s802_s3 = inlined_call_operand.vmem [shape: s32[4,1], index: 3, kind: input, shape index: {}]   ;;  %s803_s4 = inlined_call_operand.vmem [shape: f32[4,1], index: 4, kind: input, shape index: {}]   ;;  %s804_s5 = inlined_call_operand.vmem [shape: bf16[32,32], index: 5, kind: input, shape index: {}]   ;;  %s805_s6 = inlined_call_operand.vmem [shape: bf16[64,32], index: 6, kind: input, shape index: {}]   ;;  %s806_s7 = inlined_call_operand.vmem [shape: f32[1,32], index: 7, kind: input, shape index: {}]   ;;  %s807_s8 = inlined_call_operand.vmem [shape: bf16[32,32], index: 8, kind: input, shape index: {}]   ;;  %s808_s9 = inlined_call_operand.vmem [shape: bf16[32,32], index: 9, kind: input, shape index: {}]   ;;  %s809_s10 = inlined_call_operand.vmem [shape: f32[1,32], index: 10, kind: input, shape index: {}]   ;;  %s810_s11 = inlined_call_operand.vmem [shape: bf16[32,8], index: 11, kind: input, shape index: {}]   ;;  %s811_s12 = inlined_call_operand.vmem [shape: f32[1,8], index: 12, kind: input, shape index: {}]   ;;  %s812_s13 = inlined_call_operand.hbm [shape: f32[2,128], index: 13, kind: output, shape index: {}]  }
   0x1   :  { %v48_v0 = vld [vmem:[%s801_s2] sm:$0xf]  ;;  %582 = vset.pattern.permute.xlu0 %v621_v1  ;;  %583 = vset.pattern.permute.xlu1 %v621_v1 }
   0x2   :  { %v53_v2 = vld [vmem:[%s802_s3] sm:$0xf]  ;;  %50 = vperm.xlu0 %582, %v48_v0   ;;  %527 = vmatprep.subr.bf16.mxu0 %v622_v3 }
   0x3   :  { %533 = vmatprep.subr.bf16.mxu1 %v622_v3  ;;  %v584_v4 = vld [vmem:[%s800_s1] sm:$0xff]   ;;  %529 = vmatprep.mubr.msk.bf16.mxu0 %vm623_vm0, %v622_v3 }
   0x4   :  { %528 = vmatpush3.bf16.msra.mxu0 %v584_v4  ;;  %541 = vmatprep.mubr.msk.bf16.mxu1 %vm623_vm0, %v622_v3 }
   0x5   :  { %545 = vmatprep.subr.bf16.mxu0 %v622_v3 }
   0x6   :  { %55 = vperm.xlu0 %582, %v53_v2  }
   0x7   :  { %18 = vsyncpa [#allocation3], 0  ;;  %v113_v5 = vld [vmem:[%s803_s4] sm:$0xf]  ;;  %v586_v7 = vld [vmem:[%s805_s6 + $0x8] sm:$0xff]   ;;  %v46_v9 = vlaneseq  ;;  %vm69_vm4 = vcmask 130048  }
   0x8   :  { %v585_v6 = vld [vmem:[%s805_s6] sm:$0xff]   ;;  %116 = vperm.xlu1 %583, %v113_v5   ;;  %v588_v8 = vld [vmem:[%s805_s6 + $0x10] sm:$0xff]   ;;  %v589_v16 = vld [vmem:[%s804_s5 + $0x8] sm:$0xff]   ;;  %vm214_vm5 = vcmask 261120   ;;  %vm158_vm6 = vcmask 523264   ;;  %s625_s17 = smov [#allocation2]  }
   0x9   :  { %534 = vmatpush3.bf16.msra.mxu1 %v585_v6  ;;  %v47_v11 = vand.u32 127, %v46_v9  ;;  %v587_v14 = vld [vmem:[%s804_s5] sm:$0xff]   ;;  %v590_v17 = vld [vmem:[%s805_s6 + $0x18] sm:$0xff]   ;;  %v593_v32 = vld [vmem:[%s807_s8 + $0x8] sm:$0xff]   ;;  %s478_s18 = sshll.u32 %s625_s17, 4  ;;  %vm469_vm7 = vcmask 326656   ;;  %s479_s18 = int_to_ptr.vmem [resolvable:$true] %s478_s18 }
   0xa   :  { %535 = vmatprep.subr.bf16.mxu1 %v622_v3  ;;  %v120_v18 = vld [vmem:[%s799_s0] sm:$0x3]  ;;  %v594_v33 = vld [vmem:[%s808_s9 + $0x8] sm:$0xff]   ;;  %s597_s4 = scalar_lea.vmem %s479_s18, 32  ;;  %p602_p1 = scmp.lt.s32.totalorder %s479_s18, %s479_s18 }
   0xb   :  { %v591_v30 = vld [vmem:[%s807_s8] sm:$0xff]   ;;  %v596_v45 = vld [vmem:[%s810_s11 + $0x8] sm:$0xff]   ;;  %p598_p0 = scmp.ne.s32.totalorder %s479_s18, %s597_s4  ;;  %p603_p2 = scmp.lt.s32.totalorder %s597_s4, %s597_s4 }
   0xc   :  { %v592_v31 = vld [vmem:[%s808_s9] sm:$0xff]  }
   0xd   :  { %536 = vmatpush3.bf16.msra.mxu1 %v586_v7  ;;  %v496_v35 = vld [vmem:[%s806_s7] ss:$0 sm:$0xff]  ;;  %p604_p3 = por %p603_p2, %p602_p1 }
   0xe   :  { %537 = vmatprep.subr.bf16.mxu1 %v622_v3  ;;  %v595_v44 = vld [vmem:[%s810_s11] sm:$0xff]  }
   0xf   :  { %v503_v49 = vld [vmem:[%s809_s10] ss:$0 sm:$0xff]  ;;  %s624_s10 = smov 32   ;;  %p605_p4 = pnand %p604_p3, %p598_p0 }
  0x10   :  { %v504_v59 = vld [vmem:[%s811_s12] ss:$0 sm:$0xff] }
  0x11   :  { %538 = vmatpush3.bf16.msra.mxu1 %v588_v8 }
  0x12   :  { %539 = vmatprep.subr.bf16.mxu1 %v622_v3 }
  0x15   :  { %540 = vmatpush3.bf16.msra.mxu1 %v590_v17 }
  0x16   :  { %561 = vmatprep.subr.bf16.mxu1 %v622_v3 }
  0x81   :  { %v51_v10 = vpop.permute.xlu0 %50 }
  0x82   :  { %vm52_vm1 = vcmp.ge.s32.totalorder %v47_v11, %v51_v10 }
  0x85   :  { %v56_v12 = vpop.permute.xlu0 %55 }
  0x86   :  { %vm57_vm2 = vcmp.lt.s32.totalorder %v47_v11, %v56_v12 }
  0x87   :  { %vm58_vm3 = vmand %vm52_vm1, %vm57_vm2  ;;  %v117_v19 = vpop.permute.xlu1 %116 }
  0x88   :  { %v59_v13 = vsel %vm58_vm3, 1.0, %v622_v3 }
  0x89   :  { %v60_v15 = vpack.c.bf16 %v59_v13, %v59_v13 }
  0x8b   :  { %530 = vmatmul.mubr.msk.bf16.vlgmr.msra.gmra.mrb[0].mxu0 %vm69_vm4, %v60_v15 }
  0x8c   :  { %546 = vmatpush3.bf16.msra.mxu0 %v587_v14  ;;  %549 = vmatprep.mubr.msk.bf16.mxu0 %vm623_vm0, %v622_v3 }
  0x8d   :  { %547 = vmatprep.subr.bf16.mxu0 %v622_v3 }
  0x90   :  { %548 = vmatpush3.bf16.msra.mxu0 %v589_v16 }
  0x91   :  { %553 = vmatprep.subr.bf16.mxu0 %v622_v3 }
  0x93   :  { %550 = vmatmul.mubr.msk.bf16.vlgmr.msra.gmra.mrb[4].mxu0 %vm214_vm5, %v120_v18 }
  0x94   :  { %557 = vmatprep.mubr.msk.bf16.mxu0 %vm623_vm0, %v622_v3  ;;  %554 = vmatpush3.bf16.msra.mxu0 %v592_v31 }
  0x95   :  { %555 = vmatprep.subr.bf16.mxu0 %v622_v3 }
  0x98   :  { %556 = vmatpush3.bf16.msra.mxu0 %v594_v33 }
  0x99   :  { %569 = vmatprep.subr.bf16.mxu0 %v622_v3 }
 0x15e   :  { %v107_v20 = vpop.f32.mrb[0].mxu0 }
 0x15f   :  { %v119_v21 = vmul.f32 %v117_v19, %v107_v20  ;;  %v531_v22 = vpop.f32.mrb[1].mxu0 }
 0x160   :  { %v110_v23 = vpop.f32.mrb[2].mxu0 }
 0x161   :  { %v125_v24 = vpack.c.bf16 %v119_v21, %v119_v21  ;;  %v532_v25 = vpop.f32.mrb[3].mxu0 }
 0x163   :  { %542 = vmatmul.mubr.msk.bf16.vlgmr.msra.gmra.mrb[0].mxu1 %vm158_vm6, %v125_v24 }
 0x164   :  { %565 = vmatprep.mubr.msk.bf16.mxu1 %vm623_vm0, %v622_v3  ;;  %562 = vmatpush3.bf16.msra.mxu1 %v591_v30 }
 0x165   :  { %563 = vmatprep.subr.bf16.mxu1 %v622_v3 }
 0x166   :  { %v252_v26 = vpop.f32.mrb[4].mxu0 }
 0x167   :  { %v551_v27 = vpop.f32.mrb[5].mxu0 }
 0x168   :  { %v255_v28 = vpop.f32.mrb[6].mxu0  ;;  %564 = vmatpush3.bf16.msra.mxu1 %v593_v32 }
 0x169   :  { %v552_v29 = vpop.f32.mrb[7].mxu0 }
 0x236   :  { %v196_v34 = vpop.f32.mrb[0].mxu1 }
 0x237   :  { %v253_v36 = vadd.f32 %v252_v26, %v196_v34  ;;  %v543_v37 = vpop.f32.mrb[1].mxu1 }
 0x238   :  { %v199_v38 = vpop.f32.mrb[2].mxu1 }
 0x239   :  { %v265_v39 = vadd.f32 %v496_v35, %v253_v36  ;;  %v544_v40 = vpop.f32.mrb[3].mxu1 }
 0x23b   :  { %v266_v41 = vmax.f32 %v265_v39, 0.0 }
 0x23d   :  { %v267_v42 = vpack.c.bf16 %v266_v41, %v266_v41 }
 0x23f   :  { %v277_v43 = vrot.slane %v267_v42, 1  ;;  %566 = vmatmul.mubr.msk.bf16.vlgmr.msra.gmra.mrb[4].mxu1 %vm214_vm5, %v267_v42 }
 0x241   :  { %558 = vmatmul.mubr.msk.bf16.vlgmr.msra.gmra.mrb[8].mxu0 %vm214_vm5, %v277_v43 }
 0x242   :  { %573 = vmatprep.mubr.msk.bf16.mxu0 %vm623_vm0, %v622_v3  ;;  %570 = vmatpush3.bf16.msra.mxu0 %v595_v44 }
 0x243   :  { %571 = vmatprep.subr.bf16.mxu0 %v622_v3 }
 0x246   :  { %572 = vmatpush3.bf16.msra.mxu0 %v596_v45 }
 0x312   :  { %v382_v46 = vpop.f32.mrb[4].mxu1 }
 0x313   :  { %v567_v47 = vpop.f32.mrb[5].mxu1 }
 0x314   :  { %v327_v48 = vpop.f32.mrb[8].mxu0  ;;  %v385_v50 = vpop.f32.mrb[6].mxu1 }
 0x315   :  { %v383_v51 = vadd.f32 %v382_v46, %v327_v48  ;;  %v559_v52 = vpop.f32.mrb[9].mxu0  ;;  %v568_v53 = vpop.f32.mrb[7].mxu1 }
 0x316   :  { %v330_v54 = vpop.f32.mrb[10].mxu0 }
 0x317   :  { %v395_v55 = vadd.f32 %v503_v49, %v383_v51  ;;  %v560_v56 = vpop.f32.mrb[11].mxu0 }
 0x319   :  { %v396_v57 = vmax.f32 %v395_v55, 0.0 }
 0x31b   :  { %v397_v58 = vpack.c.bf16 %v396_v57, %v396_v57 }
 0x31d   :  { %574 = vmatmul.mubr.msk.bf16.vlgmr.msra.gmra.mrb[12].mxu0 %vm214_vm5, %v397_v58 }
 0x3f0   :  { %v458_v60 = vpop.f32.mrb[12].mxu0 }
 0x3f1   :  { %v459_v61 = vadd.f32 %v504_v59, %v458_v60  ;;  %v575_v62 = vpop.f32.mrb[13].mxu0 }
 0x3f2   :  { %v461_v63 = vpop.f32.mrb[14].mxu0 }
 0x3f3   :  { %465 = vrot.lane.b32.xlu1 %v459_v61, %s624_s10  ;;  %v576_v0 = vpop.f32.mrb[15].mxu0 }
 0x465   :  { %v466_v1 = vpop.permute.xlu1 %465 }
 0x466   :  { %v468_v2 = vsel %vm214_vm5, %v396_v57, %v466_v1 }
 0x467   :  { %v470_v3 = vsel %vm469_vm7, %v468_v2, 0.0 }
 0x468   :  { %471 = vst [vmem:[#allocation2] sm:$0x3] %v470_v3 }
 0x469   :  { %608 = shalt.err (!%p605_p4)
}
 0x46a   :  { %s609_s20 = scalar_lea.hbm %s812_s13, 32 }
 0x46b   :  { %p610_p5 = scmp.ne.s32.totalorder %s812_s13, %s609_s20  ;;  %p613_p6 = scmp.lt.u32.totalorder %s609_s20, %s812_s13 }
 0x46d   :  { %p615_p7 = pnand %p613_p6, %p610_p5 }
 0x46f   :  { %618 = shalt.err (!%p615_p7)
}
 0x470   :  { %481 = dma.vmem_to_hbm [thread:$0]  %s479_s18, 32, %s812_s13, [#allocation3]  }
 0x471   :  { %619 = dma.done.wait [#allocation3], 32  }
 0x472   :  { %620 = vsyncadd [#allocation3], 4294967264 }
 0x473   :  { %485 = vsyncpa [#allocation3], 1 }

</bundles_post_ra>
